<compile_context>
chip_gen: v6e
topology: v6e:2x2x1
jax: 0.10.0
libtpu: 0.0.40
codegen_flags: <defaults>
</compile_context>

<pallas_src>
import math

import jax
import jax.numpy as jnp
from jax.experimental import pallas as pl
from jax.experimental.pallas import tpu as pltpu


def _rope_kernel(x_ref, trig_ref, o_ref):
    # x_ref / trig_ref / o_ref : (TM, W) lane-dense tiles, W = pack * d_k.
    # trig rows are interleaved [cos, sin, cos, sin, ...] (module layout).
    x = x_ref[...].astype(jnp.float32)
    t = trig_ref[...].astype(jnp.float32)
    tm, w = x_ref.shape

    lane = jax.lax.broadcasted_iota(jnp.int32, (tm, w), 1)
    even = (lane & 1) == 0

    def pair_swap(a):
        # a[j ^ 1]: adjacent-pair swap via two lane rolls (XLU) + one select.
        left = pltpu.roll(a, w - 1, axis=1)   # a[j + 1] at lane j
        right = pltpu.roll(a, 1, axis=1)      # a[j - 1] at lane j
        return jnp.where(even, left, right)

    xs = pair_swap(x)                          # x[j ^ 1]
    ts = pair_swap(t)                          # sin on even lanes, cos on odd
    cos_full = jnp.where(even, t, ts)          # cos on every lane
    sin_signed = jnp.where(even, -ts, t)       # -sin on even, +sin on odd

    # out[2k]   = x[2k]   * cos - x[2k+1] * sin
    # out[2k+1] = x[2k+1] * cos + x[2k]   * sin
    o_ref[...] = (x * cos_full + xs * sin_signed).astype(o_ref.dtype)


def make_rope_table(theta, d_k, max_seq_len, dtype=jnp.float32):
    """Interleaved trig table, same layout as the PyTorch module's buffer:
    trig[i, 2k] = cos(i / theta**(2k/d_k)), trig[i, 2k+1] = sin(...)."""
    pos = jnp.arange(max_seq_len, dtype=jnp.float32)[:, None]
    lane = jnp.arange(d_k)
    exponent = (2.0 * (lane // 2).astype(jnp.float32)) / float(d_k)
    angle = pos / jnp.power(jnp.float32(theta), exponent)[None, :]
    trig = jnp.where((lane % 2) == 0, jnp.cos(angle), jnp.sin(angle))
    return trig.astype(dtype)


def rope_forward(x, token_positions, trig_tab, tile_rows=4096):
    orig_shape = x.shape
    d_k = x.shape[-1]
    assert d_k % 2 == 0, "RoPE requires an even head dimension"

    # Flatten (..., S, d_k) -> (N, d_k); positions -> (N,).
    n = x.size // d_k
    x_flat = x.reshape(n, d_k)
    pos_flat = jnp.broadcast_to(token_positions, x.shape[:-1]).reshape(-1)
    pos_flat = pos_flat.astype(jnp.int32)
    # NOTE: out-of-range positions are silently clamped by the XLA gather,
    # mirroring the unchecked indexing of the PyTorch module.

    # One fused XLA gather of the interleaved trig rows (4 B/elem written +
    # 4 B/elem re-read by the kernel, exact f32).
    # TODO(synk): fuse this gather in-kernel (VMEM-resident table + dynamic
    # row gather) once Mosaic exposes a robust arbitrary-row VMEM gather.
    trig_g = trig_tab[pos_flat].astype(jnp.float32)          # (N, d_k)

    # Lane packing: W = lcm(d_k, 128) so every load / store is 128-lane dense.
    w = d_k * (128 // math.gcd(d_k, 128))
    if w > 2048:                       # pathological d_k: fall back to natural width
        w = d_k
    pack = w // d_k

    n_pad = (-n) % pack
    if n_pad:
        x_flat = jnp.pad(x_flat, ((0, n_pad), (0, 0)))
        trig_g = jnp.pad(trig_g, ((0, n_pad), (0, 0)))
    rows = (n + n_pad) // pack
    x2 = x_flat.reshape(rows, w)
    t2 = trig_g.reshape(rows, w)

    # Tile rows: as large as a ~24 MiB double-buffered VMEM budget allows
    # (fits the default scoped limit on v5e/v6e/v7x), always a multiple of 8.
    x_item = jnp.dtype(x.dtype).itemsize
    bytes_per_row = w * (2 * x_item + 4)          # x in + out + f32 trig
    tm_vmem = max(8, ((24 * 1024 * 1024) // (2 * bytes_per_row)) // 8 * 8)
    tile_rows = max(8, (min(tile_rows, tm_vmem) // 8) * 8)

    if rows > tile_rows:
        tm = tile_rows
    elif rows >= 16:
        # Split into >=2 grid steps so v7x megacore shards the "parallel" axis.
        tm = min(rows, (((rows + 1) // 2) + 7) // 8 * 8)
    else:
        tm = rows                                  # single full-array block
    grid = (pl.cdiv(rows, tm),)

    cost = pl.CostEstimate(
        flops=6 * rows * w,
        transcendentals=0,
        bytes_accessed=rows * w * (2 * x_item + 4),
    )

    out2 = pl.pallas_call(
        _rope_kernel,
        out_shape=jax.ShapeDtypeStruct((rows, w), x.dtype),
        grid=grid,
        in_specs=[
            pl.BlockSpec((tm, w), lambda i: (i, 0)),
            pl.BlockSpec((tm, w), lambda i: (i, 0)),
        ],
        out_specs=pl.BlockSpec((tm, w), lambda i: (i, 0)),
        compiler_params=pltpu.CompilerParams(
            dimension_semantics=("parallel",),
            vmem_limit_bytes=32 * 1024 * 1024,
        ),
        cost_estimate=cost,
    )(x2, t2)

    out_flat = out2.reshape(rows * pack, d_k)
    if n_pad:
        out_flat = out_flat[:n]
    return out_flat.reshape(orig_shape)


def rope_reference(x, token_positions, theta):
    d_k = x.shape[-1]
    pos = token_positions.astype(jnp.float32)[..., None]          # (..., S, 1)
    k = jnp.arange(0, d_k, 2, dtype=jnp.float32)
    angle = pos / jnp.power(jnp.float32(theta), k / float(d_k))   # (..., S, d_k/2)
    c, s = jnp.cos(angle), jnp.sin(angle)
    xe, xo = x[..., 0::2], x[..., 1::2]
    oe = xe * c - xo * s
    oo = xe * s + xo * c
    return jnp.stack([oe, oo], axis=-1).reshape(x.shape)


if __name__ == "__main__":
    theta = 10000.0
    d_k = 32
    max_seq_len = 64
    seq_len = 8
    batch_dims = (2, 3)

    key = jax.random.PRNGKey(0)
    kx, kp = jax.random.split(key)
    x = jax.random.normal(kx, batch_dims + (seq_len, d_k), dtype=jnp.float32)
    token_positions = jax.random.randint(
        kp, batch_dims + (seq_len,), 0, max_seq_len, dtype=jnp.int32)

    trig_tab = make_rope_table(theta, d_k, max_seq_len)

    out = rope_forward(x, token_positions, trig_tab)
    out = jax.block_until_ready(out)

    ref = rope_reference(x, token_positions, theta)
    assert out.shape == x.shape and out.dtype == x.dtype
    assert jnp.allclose(out, ref, atol=1e-5, rtol=1e-5), "mismatch vs reference"

    print("KERNEL_OK")
</pallas_src>

<mosaic_0001>
module attributes {stable_mosaic.version = 11 : i64} {
  func.func @_rope_kernel(%arg0: i32, %arg1: memref<12x128xf32, #tpu.memory_space<vmem>>, %arg2: memref<12x128xf32, #tpu.memory_space<vmem>>, %arg3: memref<12x128xf32, #tpu.memory_space<vmem>>) attributes {dimension_semantics = [#tpu.dimension_semantics<parallel>], iteration_bounds = array<i64: 1>, scalar_prefetch = 0 : i64, scratch_operands = 0 : i64, tpu.core_type = #tpu.core_type<tc>, window_params = [{transform_indices = @transform_0, window_bounds = array<i64: 12, 128>}, {transform_indices = @transform_1, window_bounds = array<i64: 12, 128>}, {transform_indices = @transform_2, window_bounds = array<i64: 12, 128>}]} {
    %c0 = arith.constant 0 : index
    %c0_0 = arith.constant 0 : index
    %0 = vector.load %arg1[%c0, %c0_0] : memref<12x128xf32, #tpu.memory_space<vmem>>, vector<12x128xf32>
    %c0_1 = arith.constant 0 : index
    %c0_2 = arith.constant 0 : index
    %1 = vector.load %arg2[%c0_1, %c0_2] : memref<12x128xf32, #tpu.memory_space<vmem>>, vector<12x128xf32>
    %2 = tpu.iota {dimensions = array<i32: 1>} : vector<12x128xi32>
    %c1_i32 = arith.constant 1 : i32
    %3 = vector.broadcast %c1_i32 : i32 to vector<12x128xi32>
    %4 = arith.andi %2, %3 : vector<12x128xi32>
    %c0_i32 = arith.constant 0 : i32
    %5 = vector.broadcast %c0_i32 : i32 to vector<12x128xi32>
    %6 = arith.cmpi eq, %4, %5 : vector<12x128xi32>
    %c127_i32 = arith.constant 127 : i32
    %7 = tpu.dynamic_rotate %0 by %c127_i32 dim 1 : vector<12x128xf32>, i32 -> vector<12x128xf32>
    %c1_i32_3 = arith.constant 1 : i32
    %8 = tpu.dynamic_rotate %0 by %c1_i32_3 dim 1 : vector<12x128xf32>, i32 -> vector<12x128xf32>
    %9 = arith.select %6, %7, %8 : vector<12x128xi1>, vector<12x128xf32>
    %c127_i32_4 = arith.constant 127 : i32
    %10 = tpu.dynamic_rotate %1 by %c127_i32_4 dim 1 : vector<12x128xf32>, i32 -> vector<12x128xf32>
    %c1_i32_5 = arith.constant 1 : i32
    %11 = tpu.dynamic_rotate %1 by %c1_i32_5 dim 1 : vector<12x128xf32>, i32 -> vector<12x128xf32>
    %12 = arith.select %6, %10, %11 : vector<12x128xi1>, vector<12x128xf32>
    %13 = arith.select %6, %1, %12 : vector<12x128xi1>, vector<12x128xf32>
    %cst = arith.constant 0.000000e+00 : f32
    %14 = vector.broadcast %cst : f32 to vector<12x128xf32>
    %15 = arith.subf %14, %12 : vector<12x128xf32>
    %16 = arith.select %6, %15, %1 : vector<12x128xi1>, vector<12x128xf32>
    %17 = arith.mulf %0, %13 : vector<12x128xf32>
    %18 = arith.mulf %9, %16 : vector<12x128xf32>
    %19 = arith.addf %17, %18 : vector<12x128xf32>
    %c0_6 = arith.constant 0 : index
    %c0_7 = arith.constant 0 : index
    %20 = vector.load %arg3[%c0_6, %c0_7] : memref<12x128xf32, #tpu.memory_space<vmem>>, vector<12x128xf32>
    tpu.vector_store %arg3[%c0_6, %c0_7], %19 {strides = array<i32>} : memref<12x128xf32, #tpu.memory_space<vmem>>, vector<12x128xf32>,
    return
  }
  func.func @transform_0(%arg0: i32) -> (i32, i32) {
    %c0_i32 = arith.constant 0 : i32
    %c0_i32_0 = arith.constant 0 : i32
    return %arg0, %c0_i32 : i32, i32
  }
  func.func @transform_1(%arg0: i32) -> (i32, i32) {
    %c0_i32 = arith.constant 0 : i32
    %c0_i32_0 = arith.constant 0 : i32
    return %arg0, %c0_i32 : i32, i32
  }
  func.func @transform_2(%arg0: i32) -> (i32, i32) {
    %c0_i32 = arith.constant 0 : i32
    %c0_i32_0 = arith.constant 0 : i32
    return %arg0, %c0_i32 : i32, i32
  }
}

</mosaic_0001>

<bundles_post_ra>
// kernel: tpu_custom_call.1
= control target key start
LH: loop header
LB: loop body
LE: loop exit
PB: predicated region body
PF: predicated region fallthrough
CT: control target
= control target key end

     0   :  { %7 = vsyncpa [#allocation3], 0  ;;  %s233_s0 = inlined_call_operand.hbm [shape: f32[12,128], index: 0, kind: input, shape index: {}]   ;;  %s234_s1 = inlined_call_operand.hbm [shape: f32[12,128], index: 1, kind: input, shape index: {}]   ;;  %s235_s2 = inlined_call_operand.hbm [shape: f32[12,128], index: 2, kind: output, shape index: {}]  }
   0x1   :  { %8 = vsyncpa [#allocation6], 0 }
   0x2   :  { %9 = vsyncpa [#allocation4], 0  ;;  %s173_s9 = smov [#allocation2]  }
   0x3   :  { %s15_s10 = sshll.u32 %s173_s9, 4  ;;  %s16_s10 = int_to_ptr.vmem [resolvable:$true] %s15_s10 }
   0x4   :  { %s115_s11 = scalar_lea.vmem %s16_s10, 256  ;;  %p120_p1 = scmp.lt.s32.totalorder %s16_s10, %s16_s10 }
   0x5   :  { %p116_p0 = scmp.ne.s32.totalorder %s16_s10, %s115_s11  ;;  %p121_p2 = scmp.lt.s32.totalorder %s115_s11, %s115_s11 }
   0x7   :  { %p122_p3 = por %p121_p2, %p120_p1 }
   0x9   :  { %p123_p4 = pnand %p122_p3, %p116_p0 }
   0xb   :  { %126 = shalt.err (!%p123_p4)
}
   0xc   :  { %s174_s12 = smov 128   ;;  %s175_s13 = smov 8  }
   0xd   :  { %21 = dma.hbm_to_vmem [thread:$0]  %s233_s0, 256, %s16_s10, [#allocation3], %s174_s12, %s174_s12, %s175_s13  }
   0xe   :  { %s176_s16 = smov [#allocation5]  }
   0xf   :  { %s27_s17 = sshll.u32 %s176_s16, 4  ;;  %s28_s17 = int_to_ptr.vmem [resolvable:$true] %s27_s17 }
  0x10   :  { %s135_s18 = scalar_lea.vmem %s28_s17, 256  ;;  %p140_p6 = scmp.lt.s32.totalorder %s28_s17, %s28_s17 }
  0x11   :  { %p136_p5 = scmp.ne.s32.totalorder %s28_s17, %s135_s18  ;;  %p141_p7 = scmp.lt.s32.totalorder %s135_s18, %s135_s18 }
  0x13   :  { %p142_p8 = por %p141_p7, %p140_p6 }
  0x15   :  { %p143_p9 = pnand %p142_p8, %p136_p5 }
  0x17   :  { %146 = shalt.err (!%p143_p9)
}
  0x18   :  { %33 = dma.hbm_to_vmem [thread:$0]  %s234_s1, 256, %s28_s17, [#allocation6], %s174_s12, %s174_s12, %s175_s13  }
  0x19   :  { %167 = dma.done.wait [#allocation3], 256  }
  0x1a   :  { %168 = vsyncadd [#allocation3], 4294967040 }
  0x1b   :  { %169 = dma.done.wait [#allocation6], 256  }
  0x1c   :  { %170 = vsyncadd [#allocation6], 4294967040  ;;  %v42_v0 = vld [vmem:[#allocation5] sm:$0xff]  ;;  %s177_s0 = smov 1   ;;  %s178_s21 = smov 127   ;;  %v40_v3 = vld [vmem:[#allocation2] sm:$0xff]  ;;  %v44_v4 = vlaneseq }
  0x1d   :  { %62 = vrot.lane.b32.xlu1 %v42_v0, %s177_s0  ;;  %58 = vrot.lane.b32.xlu0 %v42_v0, %s178_s21  ;;  %v43_v1 = vld [vmem:[#allocation5 + $0x8] sm:$0xf]  ;;  %v41_v2 = vld [vmem:[#allocation2 + $0x8] sm:$0xf]  ;;  %s179_s1 = smov [#allocation7]  }
  0x1e   :  { %v45_v5 = vand.u32 127, %v44_v4  ;;  %s87_s22 = sshll.u32 %s179_s1, 4  ;;  %s88_s22 = int_to_ptr.vmem [resolvable:$true] %s87_s22 }
  0x1f   :  { %s147_s23 = scalar_lea.vmem %s88_s22, 256  ;;  %p152_p11 = scmp.lt.s32.totalorder %s88_s22, %s88_s22 }
  0x20   :  { %v46_v6 = vand.u32 1, %v45_v5  ;;  %p148_p10 = scmp.ne.s32.totalorder %s88_s22, %s147_s23  ;;  %p153_p12 = scmp.lt.s32.totalorder %s147_s23, %s147_s23 }
  0x21   :  { %64 = vrot.lane.b32.xlu1 %v43_v1, %s177_s0  ;;  %60 = vrot.lane.b32.xlu0 %v43_v1, %s178_s21 }
  0x22   :  { %vm207_vm0 = vcmp.eq.s32.totalorder %v46_v6, 0  ;;  %p154_p13 = por %p153_p12, %p152_p11 }
  0x24   :  { %p155_p0 = pnand %p154_p13, %p148_p10 }
  0x25   :  { %50 = vrot.lane.b32.xlu1 %v41_v2, %s178_s21  ;;  %48 = vrot.lane.b32.xlu0 %v40_v3, %s178_s21 }
  0x29   :  { %54 = vrot.lane.b32.xlu1 %v41_v2, %s177_s0  ;;  %52 = vrot.lane.b32.xlu0 %v40_v3, %s177_s0 }
  0x8f   :  { %v63_v7 = vpop.permute.xlu1 %62  ;;  %v59_v8 = vpop.permute.xlu0 %58 }
  0x90   :  { %v66_v12 = vsel %vm207_vm0, %v59_v8, %v63_v7  ;;  %v68_v18 = vsel %vm207_vm0, %v42_v0, %v63_v7 }
  0x91   :  { %v70_v16 = vsub.f32 0.0, %v66_v12  ;;  %v74_v26 = vmul.f32 %v68_v18, %v40_v3 }
  0x93   :  { %v65_v10 = vpop.permute.xlu1 %64  ;;  %v61_v11 = vpop.permute.xlu0 %60  ;;  %v72_v24 = vsel %vm207_vm0, %v70_v16, %v42_v0 }
  0x94   :  { %v67_v13 = vsel %vm207_vm0, %v61_v11, %v65_v10  ;;  %v69_v19 = vsel %vm207_vm0, %v43_v1, %v65_v10 }
  0x95   :  { %v71_v17 = vsub.f32 0.0, %v67_v13  ;;  %v75_v27 = vmul.f32 %v69_v19, %v41_v2 }
  0x97   :  { %v51_v14 = vpop.permute.xlu1 %50  ;;  %v49_v15 = vpop.permute.xlu0 %48  ;;  %v73_v22 = vsel %vm207_vm0, %v71_v17, %v43_v1 }
  0x9b   :  { %v55_v20 = vpop.permute.xlu1 %54  ;;  %v53_v21 = vpop.permute.xlu0 %52 }
  0x9c   :  { %v57_v23 = vsel %vm207_vm0, %v51_v14, %v55_v20  ;;  %v56_v25 = vsel %vm207_vm0, %v49_v15, %v53_v21 }
  0x9d   :  { %v77_v28 = vmul.f32 %v73_v22, %v57_v23  ;;  %v76_v29 = vmul.f32 %v72_v24, %v56_v25 }
  0x9f   :  { %v79_v30 = vadd.f32 %v77_v28, %v75_v27  ;;  %v78_v31 = vadd.f32 %v76_v29, %v74_v26 }
  0xa1   :  { %81 = vst [vmem:[#allocation7 + $0x8] sm:$0xf] %v79_v30  ;;  %80 = vst [vmem:[#allocation7] sm:$0xff] %v78_v31 }
  0xa2   :  { %158 = shalt.err (!%p155_p0)
}
  0xa3   :  { %93 = dma.vmem_to_hbm [thread:$0]  %s88_s22, 256, %s235_s2, [#allocation4], %s174_s12, %s174_s12, %s175_s13  }
  0xa4   :  { %171 = dma.done.wait [#allocation4], 256  }
  0xa5   :  { %172 = vsyncadd [#allocation4], 4294967040 }
  0xa6   :  { %97 = vsyncpa [#allocation3], 1 }
  0xa7   :  { %98 = vsyncpa [#allocation6], 1 }
  0xa8   :  { %99 = vsyncpa [#allocation4], 1 }

</bundles_post_ra>
